<compile_context>
chip_gen: v7x
topology: tpu7x:2x2x1
jax: 0.10.0
libtpu: 0.0.40
codegen_flags: <defaults>
</compile_context>

<pallas_src>
import functools
import math

import jax
import jax.numpy as jnp
from jax.experimental import pallas as pl
from jax.experimental.pallas import tpu as pltpu


# ---------------------------------------------------------------------------
# Hardware-aware sizing helpers
# ---------------------------------------------------------------------------

def _sublane_multiple(dtype) -> int:
    """Native sublane multiple: 8 for 4-byte, 16 for 2-byte, 32 for 1-byte dtypes."""
    itemsize = jnp.dtype(dtype).itemsize
    return 8 * max(1, 4 // max(1, itemsize))


def _vmem_budget_and_physical():
    """(tile budget bytes, physical VMEM bytes) for the local TPU generation."""
    phys = None
    try:
        phys = int(pltpu.get_tpu_info().vmem_capacity_bytes)
    except Exception:
        phys = None
    kind = ""
    try:
        kind = jax.devices()[0].device_kind.lower()
    except Exception:
        pass
    if phys is not None and phys <= (96 << 20):
        # v7x-class core: 64 MiB physical VMEM, 32 MiB scoped default.
        return 24 << 20, phys
    if "v5" in kind:
        # v5e: 128 MiB physical, but only a 16 MiB scoped default -> stay under.
        return 12 << 20, phys or (128 << 20)
    # v6e (or unknown 128-MiB-class chip): 32 MiB scoped default.
    return 24 << 20, phys or (128 << 20)


def _choose_row_tile(rows, w_out, itemsize, sub, budget):
    """Row tile for the single-call path, or None if even `sub` rows blow the budget."""
    per_row = 4 * w_out * itemsize        # (x0+x1+out) double-buffered, per resident row
    max_rows = budget // per_row
    if rows <= max_rows:
        tile = rows                        # full extent: always layout-legal
    elif max_rows >= sub:
        tile = (max_rows // sub) * sub     # sublane multiple: (8,128) rule ok
    else:
        return None                        # very wide rows -> column-split path
    # Keep >= 2 grid steps when rows allow so "parallel" can shard across v7x's
    # two TensorCores (costs one ~0.35us step on single-core v5e/v6e).
    if tile >= rows and rows >= 2 * sub:
        tile = max(sub, ((rows // 2) // sub) * sub)
    return tile


def _choose_col_tiles(rows, w0, itemsize, sub, budget):
    """(row tile, column tile) for the column-split path; requires 128 | w0."""
    # Modest row tile; the column axis supplies the pipelining / parallelism.
    tp = min(rows, 256, max(sub, budget // (4 * 128 * itemsize)))
    if tp < rows:
        tp = max(sub, (tp // sub) * sub)
    # Largest multiple of 128 that divides w0 and keeps 4*tp*tc*itemsize <= budget.
    max_tc = max(128, budget // (4 * tp * itemsize))
    w0_lanes = w0 // 128
    k = 1
    for cand in range(min(w0_lanes, max_tc // 128), 0, -1):
        if w0_lanes % cand == 0:
            k = cand
            break
    return tp, 128 * k


def _compiler_params(grid_rank, need_bytes, phys):
    kwargs = dict(dimension_semantics=("parallel",) * grid_rank)
    # Raise the scoped-VMEM limit only when the chosen tiles need it, clamped
    # to 75% of physical VMEM (v7x has only 64 MiB per TensorCore).
    if need_bytes > (12 << 20):
        clamp = min((phys * 3) // 4, 100 << 20)
        kwargs["vmem_limit_bytes"] = int(min(need_bytes + (4 << 20), clamp))
    return pltpu.CompilerParams(**kwargs)


# ---------------------------------------------------------------------------
# Kernel bodies (concat is pure data movement: slice-stores only)
# ---------------------------------------------------------------------------

def _make_lane_cat_kernel(w0: int):
    """Write x0 then x1 into disjoint lane ranges of the output tile."""
    def kernel(x0_ref, x1_ref, o_ref):
        o_ref[:, :w0] = x0_ref[...]
        o_ref[:, w0:] = x1_ref[...]
    return kernel


def _copy_tile_kernel(x_ref, o_ref):
    o_ref[...] = x_ref[...]


def _copy_tile_into_aliased_kernel(_prev_hbm_ref, x_ref, o_ref):
    # _prev_hbm_ref is the aliased, partially-filled output (memory_space=ANY).
    # Its already-written column blocks are preserved because this call's
    # out_spec never maps them; only x1's column blocks are written back.
    o_ref[...] = x_ref[...]


# ---------------------------------------------------------------------------
# Wrapper
# ---------------------------------------------------------------------------

@functools.partial(jax.jit, static_argnames=("dim", "vmem_budget_bytes"))
def cat_pallas(x0: jax.Array, x1: jax.Array, dim: int,
               vmem_budget_bytes=None) -> jax.Array:
    assert x0.ndim == x1.ndim, "rank mismatch"
    assert x0.dtype == x1.dtype, "dtype mismatch"
    ndim = x0.ndim
    dim = dim % ndim
    for d in range(ndim):
        if d != dim:
            assert x0.shape[d] == x1.shape[d], "non-concat dims must match"

    size0, size1 = x0.shape[dim], x1.shape[dim]
    out_shape = tuple(size0 + size1 if d == dim else x0.shape[d]
                      for d in range(ndim))

    # Lane-dense 2-D collapse: rows = prod(dims before `dim`), columns =
    # prod(dims from `dim` on).  The concat lands on the lane axis.
    rows = math.prod(x0.shape[:dim])
    trail = math.prod(x0.shape[dim + 1:])
    w0, w1 = size0 * trail, size1 * trail
    w_out = w0 + w1

    x0_2d = x0.reshape(rows, w0)
    x1_2d = x1.reshape(rows, w1)

    itemsize = jnp.dtype(x0.dtype).itemsize
    sub = _sublane_multiple(x0.dtype)
    budget, phys = _vmem_budget_and_physical()
    if vmem_budget_bytes is not None:
        budget = int(vmem_budget_bytes)
    budget = max(budget, 1 << 20)

    total_bytes = 2 * rows * w_out * itemsize   # read both inputs + write output
    tile_p = _choose_row_tile(rows, w_out, itemsize, sub, budget)

    # ---- very wide rows + lane-aligned boundary: column-split path ---------
    if tile_p is None and w0 >= 128 and w0 % 128 == 0:
        tp, tc = _choose_col_tiles(rows, w0, itemsize, sub, budget)
        need = 4 * tp * tc * itemsize
        grid_rows = pl.cdiv(rows, tp)
        n0 = w0 // tc                     # tc divides w0 by construction

        # Call 1: copy x0 into out[:, :w0] (column-tiled, pipelined).
        partial = pl.pallas_call(
            _copy_tile_kernel,
            out_shape=jax.ShapeDtypeStruct((rows, w_out), x0.dtype),
            grid=(grid_rows, n0),
            in_specs=[pl.BlockSpec((tp, tc), lambda i, j: (i, j))],
            out_specs=pl.BlockSpec((tp, tc), lambda i, j: (i, j)),
            compiler_params=_compiler_params(2, need, phys),
            cost_estimate=pl.CostEstimate(
                flops=0, transcendentals=0,
                bytes_accessed=2 * rows * w0 * itemsize),
        )(x0_2d)

        # Call 2: alias that buffer and copy x1 into out[:, w0:].
        out_2d = pl.pallas_call(
            _copy_tile_into_aliased_kernel,
            out_shape=jax.ShapeDtypeStruct((rows, w_out), x0.dtype),
            grid=(grid_rows, pl.cdiv(w1, tc)),
            in_specs=[
                pl.BlockSpec(memory_space=pl.ANY),           # aliased partial out
                pl.BlockSpec((tp, tc), lambda i, j: (i, j)),  # x1
            ],
            out_specs=pl.BlockSpec((tp, tc), lambda i, j: (i, j + n0)),
            input_output_aliases={0: 0},
            compiler_params=_compiler_params(2, need, phys),
            cost_estimate=pl.CostEstimate(
                flops=0, transcendentals=0,
                bytes_accessed=2 * rows * w1 * itemsize),
        )(partial, x1_2d)
        return out_2d.reshape(out_shape)

    # ---- rare corner: very wide rows AND unaligned concat boundary ---------
    if tile_p is None:
        # Minimal sublane-multiple row tile; vmem limit raised (clamped) below.
        tile_p = rows if rows <= sub else sub

    # ---- main path: row-tiled single call -----------------------------------
    need = 4 * tile_p * w_out * itemsize
    out_2d = pl.pallas_call(
        _make_lane_cat_kernel(w0),
        out_shape=jax.ShapeDtypeStruct((rows, w_out), x0.dtype),
        grid=(pl.cdiv(rows, tile_p),),
        in_specs=[
            pl.BlockSpec((tile_p, w0), lambda i: (i, 0)),
            pl.BlockSpec((tile_p, w1), lambda i: (i, 0)),
        ],
        out_specs=pl.BlockSpec((tile_p, w_out), lambda i: (i, 0)),
        compiler_params=_compiler_params(1, need, phys),
        cost_estimate=pl.CostEstimate(
            flops=0, transcendentals=0, bytes_accessed=total_bytes),
    )(x0_2d, x1_2d)
    return out_2d.reshape(out_shape)


if __name__ == "__main__":
    key = jax.random.PRNGKey(0)
    k0, k1, k2, k3, k4, k5, k6, k7, k8, k9 = jax.random.split(key, 10)

    # Case 1: the module's example — CAT(dim=1) on NCHW activations.
    x0 = jax.random.normal(k0, (2, 4, 16, 16), dtype=jnp.float32)
    x1 = jax.random.normal(k1, (2, 4, 16, 16), dtype=jnp.float32)
    out = jax.block_until_ready(cat_pallas(x0, x1, dim=1))
    ref = jnp.concatenate((x0, x1), axis=1)
    assert out.shape == ref.shape and jnp.array_equal(out, ref), "case 1 mismatch"

    # Case 2: asymmetric channel counts, lane-aligned, multi-step row grid.
    a0 = jax.random.normal(k2, (32, 6, 16, 128), dtype=jnp.float32)
    a1 = jax.random.normal(k3, (32, 10, 16, 128), dtype=jnp.float32)
    out2 = jax.block_until_ready(cat_pallas(a0, a1, dim=1))
    assert jnp.array_equal(out2, jnp.concatenate((a0, a1), axis=1)), "case 2 mismatch"

    # Case 3: last-dim concat with unaligned widths (masked-store corner, tiny data).
    b0 = jax.random.normal(k4, (2, 4, 16, 16), dtype=jnp.float32)
    b1 = jax.random.normal(k5, (2, 4, 16, 8), dtype=jnp.float32)
    out3 = jax.block_until_ready(cat_pallas(b0, b1, dim=-1))
    assert jnp.array_equal(out3, jnp.concatenate((b0, b1), axis=-1)), "case 3 mismatch"

    # Case 4: bf16 (16-row sublane multiple) with the >=2-step grid split.
    c0 = jax.random.normal(k6, (64, 4, 8, 128), dtype=jnp.bfloat16)
    c1 = jax.random.normal(k7, (64, 4, 8, 128), dtype=jnp.bfloat16)
    out4 = jax.block_until_ready(cat_pallas(c0, c1, dim=1))
    assert jnp.array_equal(out4, jnp.concatenate((c0, c1), axis=1)), "case 4 mismatch"

    # Case 5: force the wide-row column-split path (two aliased pallas_calls)
    # with an artificially small VMEM budget, still on small data.
    d0 = jax.random.normal(k8, (16, 8, 16, 128), dtype=jnp.float32)
    d1 = jax.random.normal(k9, (16, 8, 16, 128), dtype=jnp.float32)
    out5 = jax.block_until_ready(
        cat_pallas(d0, d1, dim=1, vmem_budget_bytes=1 << 20))
    assert jnp.array_equal(out5, jnp.concatenate((d0, d1), axis=1)), "case 5 mismatch"

    print("KERNEL_OK")
</pallas_src>

<mosaic_0001>
module attributes {stable_mosaic.version = 11 : i64} {
  func.func @kernel(%arg0: i32, %arg1: memref<2x1024xf32, #tpu.memory_space<vmem>>, %arg2: memref<2x1024xf32, #tpu.memory_space<vmem>>, %arg3: memref<2x2048xf32, #tpu.memory_space<vmem>>) attributes {dimension_semantics = [#tpu.dimension_semantics<parallel>], iteration_bounds = array<i64: 1>, scalar_prefetch = 0 : i64, scratch_operands = 0 : i64, tpu.core_type = #tpu.core_type<tc>, window_params = [{transform_indices = @transform_0, window_bounds = array<i64: 2, 1024>}, {transform_indices = @transform_1, window_bounds = array<i64: 2, 1024>}, {transform_indices = @transform_2, window_bounds = array<i64: 2, 2048>}]} {
    %c0 = arith.constant 0 : index
    %c0_0 = arith.constant 0 : index
    %0 = vector.load %arg1[%c0, %c0_0] : memref<2x1024xf32, #tpu.memory_space<vmem>>, vector<2x1024xf32>
    %c0_1 = arith.constant 0 : index
    %c0_2 = arith.constant 0 : index
    %1 = vector.load %arg3[%c0_1, %c0_2] : memref<2x2048xf32, #tpu.memory_space<vmem>>, vector<2x1024xf32>
    tpu.vector_store %arg3[%c0_1, %c0_2], %0 {strides = array<i32>} : memref<2x2048xf32, #tpu.memory_space<vmem>>, vector<2x1024xf32>,
    %c0_3 = arith.constant 0 : index
    %c0_4 = arith.constant 0 : index
    %2 = vector.load %arg2[%c0_3, %c0_4] : memref<2x1024xf32, #tpu.memory_space<vmem>>, vector<2x1024xf32>
    %c0_5 = arith.constant 0 : index
    %c1024 = arith.constant 1024 : index
    %3 = vector.load %arg3[%c0_5, %c1024] : memref<2x2048xf32, #tpu.memory_space<vmem>>, vector<2x1024xf32>
    tpu.vector_store %arg3[%c0_5, %c1024], %2 {strides = array<i32>} : memref<2x2048xf32, #tpu.memory_space<vmem>>, vector<2x1024xf32>,
    return
  }
  func.func @transform_0(%arg0: i32) -> (i32, i32) {
    %c0_i32 = arith.constant 0 : i32
    %c0_i32_0 = arith.constant 0 : i32
    return %arg0, %c0_i32 : i32, i32
  }
  func.func @transform_1(%arg0: i32) -> (i32, i32) {
    %c0_i32 = arith.constant 0 : i32
    %c0_i32_0 = arith.constant 0 : i32
    return %arg0, %c0_i32 : i32, i32
  }
  func.func @transform_2(%arg0: i32) -> (i32, i32) {
    %c0_i32 = arith.constant 0 : i32
    %c0_i32_0 = arith.constant 0 : i32
    return %arg0, %c0_i32 : i32, i32
  }
}

</mosaic_0001>

<bundles_post_ra>
// kernel: cat_pallas.1
= control target key start
LH: loop header
LB: loop body
LE: loop exit
PB: predicated region body
PF: predicated region fallthrough
CT: control target
= control target key end

     0   :  { %s62_s0 = inlined_call_operand.vmem [shape: f32[2,1024], index: 0, kind: input, shape index: {}]   ;;  %s63_s2 = inlined_call_operand.vmem [shape: f32[2,2048], index: 2, kind: output, shape index: {}]   ;;  %s64_s1 = inlined_call_operand.vmem [shape: f32[2,1024], index: 1, kind: input, shape index: {}]  }
   0x1   :  { %v11_v0 = vld [vmem:[%s62_s0] sm:$0xff]  ;;  %v12_v1 = vld [vmem:[%s62_s0 + $0x8] sm:$0xff] }
   0x2   :  { %v15_v2 = vld [vmem:[%s64_s1] sm:$0xff]  ;;  %13 = vst [vmem:[%s63_s2] sm:$0xff] %v11_v0  ;;  %14 = vst [vmem:[%s63_s2 + $0x8] sm:$0xff] %v12_v1  ;;  %v16_v3 = vld [vmem:[%s64_s1 + $0x8] sm:$0xff] }
   0x3   :  { %17 = vst [vmem:[%s63_s2 + $0x10] sm:$0xff] %v15_v2  ;;  %18 = vst [vmem:[%s63_s2 + $0x18] sm:$0xff] %v16_v3 }

</bundles_post_ra>
